<compile_context>
chip_gen: v7x
topology: tpu7x:2x2x1
jax: 0.10.0
libtpu: 0.0.40
codegen_flags: <defaults>
</compile_context>

<pallas_src>
import functools

import jax
import jax.numpy as jnp
from jax import lax
from jax.experimental import pallas as pl
from jax.experimental.pallas import tpu as pltpu

_LANE = 128                            # TPU lane width
_BLOCK_ROWS = 8192                     # (8192, 128) tile = 1M elems = 4 MiB f32 / 2 MiB bf16
_FUSED_MAX_ELEMS = 2 * 1024 * 1024     # <= ~8 MiB f32 equivalent -> single fused kernel
_XLA_FALLBACK_BYTES = 1 << 20          # tiny inputs -> plain XLA (unless force_pallas)
_TILED_VMEM_LIMIT = 32 * 1024 * 1024   # 2x4 MiB in + 2x4 MiB out + temps (v5e default is 16 MiB)
_FUSED_VMEM_LIMIT = 48 * 1024 * 1024   # whole-array block + f32 temps; < v7x 64 MiB physical


# --------------------------------------------------------------------------------------
# Kernels
# --------------------------------------------------------------------------------------
def _fused_kernel(x_ref, o_ref, *, inv_n):
    """Whole array resident in VMEM: sum -> mean -> subtract in one pass."""
    x = x_ref[...].astype(jnp.float32)
    mean = jnp.sum(x) * inv_n                     # inv_n = 1/n (static Python float)
    o_ref[...] = (x - mean).astype(o_ref.dtype)


def _sum_kernel(x_ref, acc_ref, *, tiles_per_shard, num_tiles, block_rows, rows_total,
                needs_tile_guard):
    """Phase 1: accumulate per-shard (8,128) f32 partial sums (elementwise VPU adds)."""
    p = pl.program_id(0)                          # parallel shard (TensorCore) index
    i = pl.program_id(1)                          # reduction step within the shard
    t = p * tiles_per_shard + i                   # virtual row-tile index

    @pl.when(i == 0)
    def _init():
        acc_ref[...] = jnp.zeros_like(acc_ref)

    def _accumulate():
        x = x_ref[...].astype(jnp.float32)
        if rows_total % block_rows != 0:
            # Ragged last tile: rows beyond the true array contain unspecified values.
            row0 = t * block_rows
            rid = row0 + lax.broadcasted_iota(jnp.int32, (block_rows, 1), 0)
            x = jnp.where(rid < rows_total, x, 0.0)
        # (block_rows,128) -> (block_rows//8, 8, 128) matches the native (8,128) tiling,
        # so the reshape is free and the axis-0 sum is pure elementwise vector adds.
        acc_ref[...] += x.reshape(block_rows // 8, 8, _LANE).sum(axis=0)

    if needs_tile_guard:
        pl.when(t < num_tiles)(_accumulate)       # skip over-coverage tiles entirely
    else:
        _accumulate()


def _sub_kernel(mean_ref, x_ref, o_ref):
    """Phase 2: o = x - mean (mean read from SMEM; subtract in f32, cast at the store)."""
    m = mean_ref[0, 0]
    o_ref[...] = (x_ref[...].astype(jnp.float32) - m).astype(o_ref.dtype)


# --------------------------------------------------------------------------------------
# Wrapper
# --------------------------------------------------------------------------------------
@functools.partial(jax.jit, static_argnames=("force_pallas",))
def centered_layer(X, force_pallas=False):
    """X - X.mean() over all elements (CenteredLayer forward)."""
    orig_shape = X.shape
    orig_dtype = X.dtype
    n = X.size

    # Tiny inputs: two kernel launches are pure overhead -> let XLA do it.
    if (not force_pallas) and n * jnp.dtype(orig_dtype).itemsize < _XLA_FALLBACK_BYTES:
        return X - jnp.mean(X)

    # ---------------- fused single-pass path (fits comfortably in VMEM) ----------------
    if n <= _FUSED_MAX_ELEMS:
        if n % _LANE == 0:
            x2 = X.reshape(n // _LANE, _LANE)          # lane-dense view, no copy
        elif X.ndim >= 2:
            x2 = X.reshape(-1, orig_shape[-1])         # full-array block: any 2-D shape ok
        else:
            x2 = X.reshape(1, n)
        out2 = pl.pallas_call(
            functools.partial(_fused_kernel, inv_n=1.0 / n),
            out_shape=jax.ShapeDtypeStruct(x2.shape, orig_dtype),
            compiler_params=pltpu.CompilerParams(vmem_limit_bytes=_FUSED_VMEM_LIMIT),
        )(x2)
        return out2.reshape(orig_shape)

    # ------------------------------ two-phase tiled path -------------------------------
    flat = X.reshape(-1)
    pad = (-n) % _LANE
    n_p = n + pad
    if pad:
        # Rare case (n not a multiple of 128): a small zero pad is needed to form the
        # lane-dense 2-D view.  All 128-aligned sizes (the common case) take the
        # no-copy path; the true element count n is still used for the mean.
        flat = jnp.pad(flat, (0, pad))
    rows_total = n_p // _LANE
    block_rows = _BLOCK_ROWS
    num_tiles = pl.cdiv(rows_total, block_rows)        # >= 2 given the fused threshold

    num_shards = 2 if num_tiles >= 2 else 1            # split reduction across v7x's 2 TCs
    tiles_per_shard = pl.cdiv(num_tiles, num_shards)
    needs_tile_guard = (num_shards * tiles_per_shard) != num_tiles

    x2d = flat.reshape(rows_total, _LANE)

    # Phase 1: global sum -> (num_shards, 8, 128) partial accumulators.
    def sum_in_map(p, i):
        # Clamp so over-coverage virtual tiles never generate an out-of-range DMA;
        # their contribution is skipped inside the kernel via pl.when.
        return (jnp.minimum(p * tiles_per_shard + i, num_tiles - 1), 0)

    partials = pl.pallas_call(
        functools.partial(_sum_kernel, tiles_per_shard=tiles_per_shard,
                          num_tiles=num_tiles, block_rows=block_rows,
                          rows_total=rows_total, needs_tile_guard=needs_tile_guard),
        out_shape=jax.ShapeDtypeStruct((num_shards, 8, _LANE), jnp.float32),
        grid=(num_shards, tiles_per_shard),
        in_specs=[pl.BlockSpec((block_rows, _LANE), sum_in_map)],
        out_specs=pl.BlockSpec((None, 8, _LANE), lambda p, i: (p, 0, 0)),
        compiler_params=pltpu.CompilerParams(
            dimension_semantics=("parallel", "arbitrary"),
            vmem_limit_bytes=_TILED_VMEM_LIMIT),
    )(x2d)

    # Single cross-lane reduce of the tiny partials + mean with the TRUE element count.
    mean = (jnp.sum(partials) * (1.0 / n)).reshape(1, 1).astype(jnp.float32)

    # Phase 2: elementwise subtract; "parallel" axis shards tiles across TensorCores.
    out2d = pl.pallas_call(
        _sub_kernel,
        out_shape=jax.ShapeDtypeStruct((rows_total, _LANE), orig_dtype),
        grid=(num_tiles,),
        in_specs=[
            pl.BlockSpec(memory_space=pltpu.MemorySpace.SMEM),        # mean scalar (SMEM)
            pl.BlockSpec((block_rows, _LANE), lambda i: (i, 0)),      # x tile
        ],
        out_specs=pl.BlockSpec((block_rows, _LANE), lambda i: (i, 0)),
        compiler_params=pltpu.CompilerParams(
            dimension_semantics=("parallel",),
            vmem_limit_bytes=_TILED_VMEM_LIMIT),
    )(mean, x2d)

    out_flat = out2d.reshape(-1)
    if pad:
        out_flat = out_flat[:n]                        # only for non-128-aligned shapes
    return out_flat.reshape(orig_shape)


# --------------------------------------------------------------------------------------
# Demo / self-test
# --------------------------------------------------------------------------------------
if __name__ == "__main__":
    key = jax.random.PRNGKey(0)
    # Small NCHW input consistent with a d2l-style layer: batch=2, channels=4, 16x16.
    X = jax.random.normal(key, (2, 4, 16, 16), dtype=jnp.float32)

    out = jax.block_until_ready(centered_layer(X, force_pallas=True))
    ref = X - jnp.mean(X)
    assert out.shape == X.shape and out.dtype == X.dtype
    assert jnp.allclose(out, ref, atol=1e-5, rtol=1e-5), "mismatch vs reference (fused)"
    assert abs(float(jnp.mean(out))) < 1e-5

    # Element count NOT divisible by 128 (non-lane-aligned fused path).
    Y = jax.random.normal(jax.random.PRNGKey(1), (3, 5, 7, 9), dtype=jnp.float32)
    out_y = jax.block_until_ready(centered_layer(Y, force_pallas=True))
    assert jnp.allclose(out_y, Y - jnp.mean(Y), atol=1e-5, rtol=1e-5), "mismatch (odd n)"

    # Moderate input that exercises the two-phase tiled path (ragged tail, 2 shards).
    Z = jax.random.normal(jax.random.PRNGKey(2), (2048, 1040), dtype=jnp.float32)
    out_z = jax.block_until_ready(centered_layer(Z))
    assert jnp.allclose(out_z, Z - jnp.mean(Z), atol=1e-4, rtol=1e-5), "mismatch (tiled)"

    print("KERNEL_OK")
</pallas_src>

<mosaic_0001>
module attributes {stable_mosaic.version = 11 : i64} {
  func.func @_fused_kernel(%arg0: memref<16x128xf32, #tpu.memory_space<vmem>>, %arg1: memref<16x128xf32, #tpu.memory_space<vmem>>) attributes {dimension_semantics = [], scalar_prefetch = 0 : i64, scratch_operands = 0 : i64, tpu.core_type = #tpu.core_type<tc>} {
    %c0 = arith.constant 0 : index
    %c0_0 = arith.constant 0 : index
    %0 = vector.load %arg0[%c0, %c0_0] : memref<16x128xf32, #tpu.memory_space<vmem>>, vector<16x128xf32>
    %1 = vector.shape_cast %0 : vector<16x128xf32> to vector<1x16x128xf32>
    %cst = arith.constant dense<0.000000e+00> : vector<1xf32>
    %2 = vector.multi_reduction <add>, %1, %cst [1, 2] : vector<1x16x128xf32> to vector<1xf32>
    %3 = vector.shape_cast %2 : vector<1xf32> to vector<1x1x1xf32>
    %4 = vector.extract %3[0, 0, 0] : f32 from vector<1x1x1xf32>
    %cst_1 = arith.constant 4.8828125E-4 : f32
    %5 = arith.mulf %4, %cst_1 : f32
    %6 = vector.broadcast %5 : f32 to vector<16x128xf32>
    %7 = arith.subf %0, %6 : vector<16x128xf32>
    %c0_2 = arith.constant 0 : index
    %c0_3 = arith.constant 0 : index
    %8 = vector.load %arg1[%c0_2, %c0_3] : memref<16x128xf32, #tpu.memory_space<vmem>>, vector<16x128xf32>
    tpu.vector_store %arg1[%c0_2, %c0_3], %7 {strides = array<i32>} : memref<16x128xf32, #tpu.memory_space<vmem>>, vector<16x128xf32>,
    return
  }
}

</mosaic_0001>

<bundles_post_ra>
// kernel: centered_layer.1
= control target key start
LH: loop header
LB: loop body
LE: loop exit
PB: predicated region body
PF: predicated region fallthrough
CT: control target
= control target key end

     0   :  { %s54_s0 = inlined_call_operand.vmem [shape: f32[16,128], index: 0, kind: input, shape index: {}]   ;;  %s55_s1 = inlined_call_operand.vmem [shape: f32[16,128], index: 1, kind: output, shape index: {}]  }
   0x1   :  { %v8_v0 = vld [vmem:[%s54_s0] sm:$0xff]  ;;  %v9_v1 = vld [vmem:[%s54_s0 + $0x8] sm:$0xff] }
   0x2   :  { %v10_v2 = vadd.f32 %v9_v1, %v8_v0 }
   0x4   :  { %11 = vadd.xlane.f32.xlu0 %v10_v2 }
  0x91   :  { %v12_v3 = vpop.xlane.xlu0 %11 }
  0x92   :  { %v13_v4 = vrot.slane %v12_v3, 4 }
  0x94   :  { %v14_v5 = vadd.f32 %v13_v4, %v12_v3 }
  0x96   :  { %v15_v6 = vrot.slane %v14_v5, 2 }
  0x98   :  { %v16_v7 = vadd.f32 %v15_v6, %v14_v5 }
  0x9a   :  { %v17_v8 = vrot.slane %v16_v7, 1 }
  0x9c   :  { %v18_v9 = vadd.f32 %v17_v8, %v16_v7 }
  0x9e   :  { %30 = vpush %v18_v9 }
  0xcf   :  { %s31_s10 = spop %30 }
  0xd0   :  { %s20_s11 = smul.f32 0.00048828125, %s31_s10 }
  0xd2   :  { %v21_v10 = vstv %s20_s11 }
  0xd3   :  { %v22_v11 = vsub.f32 %v8_v0, %v21_v10  ;;  %v23_v12 = vsub.f32 %v9_v1, %v21_v10 }
  0xd5   :  { %24 = vst [vmem:[%s55_s1] sm:$0xff] %v22_v11  ;;  %25 = vst [vmem:[%s55_s1 + $0x8] sm:$0xff] %v23_v12 }

</bundles_post_ra>
